<compile_context>
chip_gen: v5e
topology: v5e:2x2
jax: 0.10.0
libtpu: 0.0.40
codegen_flags: <defaults>
</compile_context>

<pallas_src>
import functools

import jax
import jax.numpy as jnp
import numpy as np
from jax.experimental import pallas as pl
from jax.experimental.pallas import tpu as pltpu

EPS = 1e-5


def _round_up(x, m):
    return (x + m - 1) // m * m


# --------------------------------------------------------------------------
# One-time probe of pltpu.roll's rotation direction (hardware convention).
# Must be warmed OUTSIDE of any jit trace (done at the top of __main__).
# Returns s such that pltpu.roll(x, (s*off) % n, axis)[i] == x[(i + off) % n].
# --------------------------------------------------------------------------
@functools.lru_cache(maxsize=None)
def _roll_shift_sign():
    def probe(x_ref, o_ref):
        o_ref[...] = pltpu.roll(x_ref[...], 1, 1)

    x = jnp.broadcast_to(jnp.arange(128, dtype=jnp.int32)[None, :], (8, 128))
    vspec = pl.BlockSpec(memory_space=pltpu.MemorySpace.VMEM)
    out = pl.pallas_call(
        probe, out_shape=jax.ShapeDtypeStruct((8, 128), jnp.int32),
        in_specs=[vspec], out_specs=vspec)(x)
    first = int(out[0, 0])
    if first == 127:      # jnp.roll convention: out[i] = x[(i - shift) % n]
        return -1
    if first == 1:        # opposite convention: out[i] = x[(i + shift) % n]
        return 1
    raise RuntimeError(f"unexpected pltpu.roll semantics (out[0,0]={first})")


# --------------------------------------------------------------------------
# Fused Pallas kernel
# --------------------------------------------------------------------------
def _basic_block_kernel(x_ref, w1_ref, w2_ref, g1_ref, b1_ref, g2_ref, b2_ref,
                        mask_ref, o_ref, *, offsets, inv_m, roll_sign,
                        mxu_dtype):
    """conv3x3+BN+ReLU, conv3x3+BN, residual add — all on VMEM-resident data.

    Layout: activations are (C, Q) frames — channels on sublanes, flattened
    zero-padded-grid pixels (padded to a multiple of 128) on lanes.
    `offsets` are the static flat-pixel offsets of the nine 3x3 taps.
    `mask_ref` is 1.0 at the N*Ho*Wo interior pixels, 0 elsewhere.
    """
    c_out, q = o_ref.shape
    # Hoist a single sublane-broadcast of the interior mask; it is reused by
    # both BN stats and the conv2 input (JAX does not CSE broadcast_in_dim).
    vm = jnp.broadcast_to(mask_ref[...], (c_out, q))

    def conv3x3(src, w_ref):
        # src: (C, q) f32 frame.  Each tap is a circular lane-roll (XLU); the
        # wrapped lanes only affect non-interior frame positions, which are
        # masked out downstream.  All nine taps are stacked along sublanes and
        # contracted in ONE MXU matmul with K = 9*C.
        wins = [src if off == 0
                else pltpu.roll(src, (roll_sign * off) % q, 1)
                for off in offsets]
        stacked = jnp.concatenate(wins, axis=0).astype(mxu_dtype)   # (9C, q)
        return jnp.dot(w_ref[...], stacked,
                       preferred_element_type=jnp.float32)          # (Co, q)

    def batchnorm(acc, g_ref, b_ref):
        # Single-pass batch stats over interior pixels only (biased variance,
        # matching BatchNorm2d(track_running_stats=False)).
        masked = acc * vm
        mean = jnp.sum(masked, axis=-1, keepdims=True) * inv_m
        var = jnp.sum(masked * acc, axis=-1, keepdims=True) * inv_m - mean * mean
        scale = g_ref[...] * jax.lax.rsqrt(var + EPS)
        return acc * scale + (b_ref[...] - mean * scale)

    # conv1 + BN1 + ReLU; zero non-interior positions so conv2 sees the
    # zero-padding semantics of the padded grid.
    y1 = jnp.maximum(batchnorm(conv3x3(x_ref[...], w1_ref), g1_ref, b1_ref),
                     0.0)
    y1 = y1 * vm

    # conv2 + BN2 + residual (downsample=None: residual is the input frame,
    # re-read here so the first load's live range ends after conv1).
    y2 = batchnorm(conv3x3(y1, w2_ref), g2_ref, b2_ref)
    o_ref[...] = y2 + x_ref[...]


# --------------------------------------------------------------------------
# Wrapper: layout plumbing (cheap XLA pad/transpose) + pallas_call
# --------------------------------------------------------------------------
def basic_block_forward(x_nchw, params, *, stride=1, pad=1, dilation=1,
                        mxu_dtype=jnp.bfloat16):
    """BasicBlock.forward with downsample=None.  Input/output layout: NCHW.

    Conv padding follows the convbn convention: padding = dilation if
    dilation > 1 else pad.  downsample=None requires stride == 1 and
    inplanes == planes (the PyTorch module's `out += x` requires it too).
    """
    N, cin, H, W = x_nchw.shape
    cmid, cin_w, kh_, kw_ = params["w1"].shape
    cout = params["w2"].shape[0]
    if stride != 1:
        raise ValueError("downsample=None requires stride == 1")
    if (cin_w != cin or params["w2"].shape[1] != cmid or cout != cin
            or cmid != cin):
        raise ValueError("downsample=None requires inplanes == planes")
    if (kh_, kw_) != (3, 3):
        raise ValueError("only 3x3 convolutions are supported")

    d = dilation
    pad_eff = d if d > 1 else pad
    Ho = H + 2 * pad_eff - 2 * d
    Wo = W + 2 * pad_eff - 2 * d
    if (Ho, Wo) != (H, W):
        raise ValueError("residual add requires output size == input size "
                         "(use pad == dilation)")

    Hp, Wp = H + 2 * pad_eff, W + 2 * pad_eff
    G = N * Hp * Wp                        # flat padded-grid length
    Q = _round_up(G, 128)                  # lane-dense compute frame

    # 3x3 tap offsets on the flat pixel axis (center-anchored output frame).
    offsets = tuple((kh * d - pad_eff) * Wp + (kw * d - pad_eff)
                    for kh in range(3) for kw in range(3))

    # Activation frame: NCHW -> zero-pad H/W -> (Cin, N*Hp*Wp) -> tail-pad to Q.
    # TODO(synk): at real ResNet sizes, fold this padding/layout into the DMA
    # path of a pixel-tiled grid instead of materializing it in HBM.
    xp = jnp.pad(x_nchw.astype(jnp.float32),
                 ((0, 0), (0, 0), (pad_eff, pad_eff), (pad_eff, pad_eff)))
    x_frame = jnp.pad(jnp.transpose(xp, (1, 0, 2, 3)).reshape(cin, G),
                      ((0, 0), (0, Q - G)))

    # Interior-pixel mask over the frame (static, built on host).
    m2d = np.zeros((Hp, Wp), np.float32)
    m2d[pad_eff:pad_eff + Ho, pad_eff:pad_eff + Wo] = 1.0
    vmask = jnp.asarray(
        np.pad(np.tile(m2d.reshape(-1), N), (0, Q - G)).reshape(1, Q))

    # Weights packed lane-dense & tap-major for the folded-K matmul:
    # (Cout, Cin, 3, 3) -> (Cout, 3, 3, Cin) -> (Cout, 9*Cin), in MXU dtype.
    w1p = jnp.transpose(params["w1"], (0, 2, 3, 1)).reshape(
        cmid, 9 * cin).astype(mxu_dtype)
    w2p = jnp.transpose(params["w2"], (0, 2, 3, 1)).reshape(
        cout, 9 * cmid).astype(mxu_dtype)
    g1 = params["g1"].astype(jnp.float32).reshape(cmid, 1)
    b1 = params["b1"].astype(jnp.float32).reshape(cmid, 1)
    g2 = params["g2"].astype(jnp.float32).reshape(cout, 1)
    b2 = params["b2"].astype(jnp.float32).reshape(cout, 1)

    m_valid = N * Ho * Wo
    kernel = functools.partial(_basic_block_kernel, offsets=offsets,
                               inv_m=1.0 / m_valid,
                               roll_sign=_roll_shift_sign(),
                               mxu_dtype=mxu_dtype)

    op_bytes = jnp.dtype(mxu_dtype).itemsize
    flops = 2 * 9 * Q * (cin * cmid + cmid * cout)
    bytes_accessed = (4 * cin * Q + 4 * cout * Q + 4 * Q
                      + op_bytes * 9 * (cin * cmid + cmid * cout)
                      + 4 * 2 * (cmid + cout))
    vmem_spec = pl.BlockSpec(memory_space=pltpu.MemorySpace.VMEM)

    out2d = pl.pallas_call(
        kernel,
        out_shape=jax.ShapeDtypeStruct((cout, Q), jnp.float32),
        in_specs=[vmem_spec] * 8,
        out_specs=vmem_spec,
        cost_estimate=pl.CostEstimate(flops=flops,
                                      transcendentals=cmid + cout,
                                      bytes_accessed=bytes_accessed),
    )(x_frame, w1p, w2p, g1, b1, g2, b2, vmask)

    out = out2d[:, :G].reshape(cout, N, Hp, Wp)[:, :, pad_eff:pad_eff + Ho,
                                                pad_eff:pad_eff + Wo]
    return jnp.transpose(out, (1, 0, 2, 3))


# --------------------------------------------------------------------------
# Pure-JAX reference (for a silent correctness check)
# --------------------------------------------------------------------------
def _ref_convbn(x_nchw, w, gamma, beta, stride, pad, dilation):
    pad_eff = dilation if dilation > 1 else pad
    y = jax.lax.conv_general_dilated(
        x_nchw, w, window_strides=(stride, stride),
        padding=((pad_eff, pad_eff), (pad_eff, pad_eff)),
        rhs_dilation=(dilation, dilation),
        dimension_numbers=("NCHW", "OIHW", "NCHW"))
    mean = y.mean(axis=(0, 2, 3), keepdims=True)
    var = y.var(axis=(0, 2, 3), keepdims=True)
    return (gamma.reshape(1, -1, 1, 1) * (y - mean) / jnp.sqrt(var + EPS)
            + beta.reshape(1, -1, 1, 1))


def _ref_basic_block(x_nchw, params, *, stride, pad, dilation):
    out = jnp.maximum(
        _ref_convbn(x_nchw, params["w1"], params["g1"], params["b1"],
                    stride, pad, dilation), 0.0)
    out = _ref_convbn(out, params["w2"], params["g2"], params["b2"],
                      1, pad, dilation)
    return out + x_nchw


# --------------------------------------------------------------------------
if __name__ == "__main__":
    # BasicBlock(inplanes=8, planes=8, stride=1, downsample=None, pad=1, dilation=1)
    inplanes, planes = 8, 8
    stride, pad, dilation = 1, 1, 1
    N, H, W = 2, 16, 16

    key = jax.random.PRNGKey(0)
    k_x, k_w1, k_w2, k_g1, k_b1, k_g2, k_b2 = jax.random.split(key, 7)

    x = jax.random.normal(k_x, (N, inplanes, H, W), dtype=jnp.float32)

    params = {
        "w1": 0.1 * jax.random.normal(k_w1, (planes, inplanes, 3, 3), jnp.float32),
        "g1": 1.0 + 0.1 * jax.random.normal(k_g1, (planes,), jnp.float32),
        "b1": 0.1 * jax.random.normal(k_b1, (planes,), jnp.float32),
        "w2": 0.1 * jax.random.normal(k_w2, (planes, planes, 3, 3), jnp.float32),
        "g2": 1.0 + 0.1 * jax.random.normal(k_g2, (planes,), jnp.float32),
        "b2": 0.1 * jax.random.normal(k_b2, (planes,), jnp.float32),
    }

    ref = jax.block_until_ready(
        _ref_basic_block(x, params, stride=stride, pad=pad, dilation=dilation))

    _roll_shift_sign()   # warm the cached roll-direction probe OUTSIDE of jit

    # Performance default: bf16 MXU operands (f32 accumulation / f32 BN math).
    # bf16 operand rounding drifts vs. the f32 reference, hence the looser tol.
    fwd = jax.jit(functools.partial(basic_block_forward, stride=stride,
                                    pad=pad, dilation=dilation,
                                    mxu_dtype=jnp.bfloat16))
    out = jax.block_until_ready(fwd(x, params))
    np.testing.assert_allclose(np.asarray(out), np.asarray(ref),
                               rtol=5e-2, atol=5e-2)

    # Tight numerical check of the kernel's indexing/math with f32 MXU operands.
    fwd_f32 = jax.jit(functools.partial(basic_block_forward, stride=stride,
                                        pad=pad, dilation=dilation,
                                        mxu_dtype=jnp.float32))
    out_f32 = jax.block_until_ready(fwd_f32(x, params))
    np.testing.assert_allclose(np.asarray(out_f32), np.asarray(ref),
                               rtol=2e-3, atol=2e-3)

    print("KERNEL_OK")
</pallas_src>

<mosaic_0001>
module attributes {stable_mosaic.version = 11 : i64} {
  func.func @probe(%arg0: memref<8x128xi32, #tpu.memory_space<vmem>>, %arg1: memref<8x128xi32, #tpu.memory_space<vmem>>) attributes {dimension_semantics = [], scalar_prefetch = 0 : i64, scratch_operands = 0 : i64, tpu.core_type = #tpu.core_type<tc>} {
    %c0 = arith.constant 0 : index
    %c0_0 = arith.constant 0 : index
    %0 = vector.load %arg0[%c0, %c0_0] : memref<8x128xi32, #tpu.memory_space<vmem>>, vector<8x128xi32>
    %c1_i32 = arith.constant 1 : i32
    %1 = tpu.dynamic_rotate %0 by %c1_i32 dim 1 : vector<8x128xi32>, i32 -> vector<8x128xi32>
    %c0_1 = arith.constant 0 : index
    %c0_2 = arith.constant 0 : index
    %2 = vector.load %arg1[%c0_1, %c0_2] : memref<8x128xi32, #tpu.memory_space<vmem>>, vector<8x128xi32>
    tpu.vector_store %arg1[%c0_1, %c0_2], %1 {strides = array<i32>} : memref<8x128xi32, #tpu.memory_space<vmem>>, vector<8x128xi32>,
    return
  }
}

</mosaic_0001>

<bundles_post_ra>
// kernel: tpu_custom_call.1
= control target key start
LH: loop header
LB: loop body
LE: loop exit
PB: predicated region body
PF: predicated region fallthrough
CT: control target
= control target key end

     0   :  { %6 = vsyncpa [#allocation3], 0  ;;  %s118_s0 = inlined_call_operand.hbm [shape: s32[8,128], index: 0, kind: input, shape index: {}]   ;;  %s119_s1 = inlined_call_operand.hbm [shape: s32[8,128], index: 1, kind: output, shape index: {}]  }
   0x1   :  { %7 = vsyncpa [#allocation4], 0  ;;  %s13_s8 = sshll.u32 %s118_s0, 4  ;;  %s99_s9 = smov [#allocation2]   ;;  %s14_s8 = int_to_ptr.hbm [resolvable:$true] %s13_s8 }
   0x2   :  { %s15_s10 = sshll.u32 %s99_s9, 4  ;;  %s16_s10 = int_to_ptr.vmem [resolvable:$true] %s15_s10 }
   0x3   :  { %18 = dma.hbm_to_vmem [thread:$0]  %s14_s8, 128, %s16_s10, [#allocation3]  }
   0x4   :  { %95 = dma.done.wait [#allocation3], 128  }
   0x5   :  { %96 = vsyncadd [#allocation3], 4294967168  ;;  %v23_v0 = vld [vmem:[#allocation2] sm:$0xff]  ;;  %s100_s11 = smov 1   ;;  %s101_s12 = smov [#allocation5]  }
   0x6   :  { %24 = vrot.lane.b32.xlu0 %v23_v0, %s100_s11  ;;  %s32_s13 = sshll.u32 %s101_s12, 4  ;;  %s34_s16 = sshll.u32 %s119_s1, 4  ;;  %s33_s13 = int_to_ptr.vmem [resolvable:$true] %s32_s13  ;;  %s35_s16 = int_to_ptr.hbm [resolvable:$true] %s34_s16 }
  0x78   :  { %v25_v1 = vpop.permute.xlu0 %24 }
  0x79   :  { %26 = vst [vmem:[#allocation5] sm:$0xff] %v25_v1 }
  0x7a   :  { %37 = dma.vmem_to_hbm [thread:$0]  %s33_s13, 128, %s35_s16, [#allocation4]  }
  0x7b   :  { %97 = dma.done.wait [#allocation4], 128  }
  0x7c   :  { %98 = vsyncadd [#allocation4], 4294967168 }
  0x7d   :  { %42 = vsyncpa [#allocation3], 1 }
  0x7e   :  { %43 = vsyncpa [#allocation4], 1 }

</bundles_post_ra>
